<compile_context>
chip_gen: v6e
topology: v6e:2x2x1
jax: 0.10.0
libtpu: 0.0.40
codegen_flags: <defaults>
</compile_context>

<pallas_src>
import functools

import jax
import jax.numpy as jnp
import numpy as np
from jax.experimental import pallas as pl
from jax.experimental.pallas import tpu as pltpu

_LANE = 128                 # lane width: alignment for last-dim (W) band slices
_SUBLANE = 8                # sublane count: alignment for second-minor (H) slices
_MAX_UNROLLED_MATMULS = 256  # plane/tile loops are statically unrolled


def _vmem_capacity_bytes() -> int:
    """Per-core VMEM capacity (128 MiB v5e/v6e, 64 MiB/TC v7x)."""
    # Narrow try/except: a failed hardware query only selects the conservative
    # default; kernel/lowering errors are NOT swallowed anywhere.
    try:
        return int(pltpu.get_tpu_info().vmem_capacity_bytes)
    except Exception:  # hardware-info query only
        return 64 * 1024 * 1024


def _axis_taps(out_size, crop_size, in_size):
    """Per-output-pixel 2-tap source indices/weights (crop offset folded in).

    torchvision F.center_crop: crop_top = int(round((in - crop)/2.0)) (Python
    banker's rounding matches torchvision).  Resize is bilinear,
    align_corners=False.
    """
    top = int(round((in_size - crop_size) / 2.0))
    scale = crop_size / out_size
    src = (np.arange(out_size, dtype=np.float64) + 0.5) * scale - 0.5
    src = np.clip(src, 0.0, crop_size - 1)
    lo = np.floor(src).astype(np.int64)
    hi = np.minimum(lo + 1, crop_size - 1)
    w_hi = src - lo
    w_lo = 1.0 - w_hi
    return lo + top, hi + top, w_lo, w_hi


def _banded_axis(out_size, crop_size, in_size, tile, align):
    """Banded interpolation weights for one axis.

    Each output pixel touches 2 adjacent input pixels and the map is monotone,
    so a `tile`-wide output block only reads a ~tile*scale+2 wide input band
    whose start is a compile-time constant.  We ship the (out_size, band)
    weight slab + per-tile band starts instead of the dense (out, in) matrix.
    Band starts are rounded down to `align` so every in-kernel slice is
    vreg-aligned (8 sublanes for the H pass, 128 lanes for the W pass).
    """
    lo, hi, w_lo, w_hi = _axis_taps(out_size, crop_size, in_size)
    n_tiles = -(-out_size // tile)
    starts, spans = [], []
    for t in range(n_tiles):
        o0, o1 = t * tile, min(out_size, (t + 1) * tile)
        s = (int(lo[o0]) // align) * align
        starts.append(s)
        spans.append(int(hi[o1 - 1]) + 1 - s)
    band = -(-max(spans) // align) * align
    band = min(band, in_size)
    starts = [max(0, min(s, in_size - band)) for s in starts]

    weights = np.zeros((out_size, band), dtype=np.float64)
    for o in range(out_size):
        s = starts[min(o // tile, n_tiles - 1)]
        weights[o, int(lo[o]) - s] += w_lo[o]
        weights[o, int(hi[o]) - s] += w_hi[o]
    return weights, starts, band, n_tiles


def _col_weight_blocks(weights, out_size, tile, n_tiles):
    """Per-output-tile transposed (band, tile) column-weight blocks."""
    band = weights.shape[1]
    blocks = np.zeros((n_tiles, band, tile), dtype=np.float64)
    for t in range(n_tiles):
        o0, o1 = t * tile, min(out_size, (t + 1) * tile)
        blocks[t, :, : o1 - o0] = weights[o0:o1, :].T
    return blocks


def _make_kernel(bp, h_out, w_out, t1, t2, starts_h, band_h, starts_w, band_w,
                 mat_dtype, round_output):
    n_t1, n_t2 = len(starts_h), len(starts_w)

    def kernel(x_ref, wrow_ref, wcol_ref, o_ref, tmp_ref):
        # x_ref:    (bp, H_in, W_in)   input planes (original dtype)
        # wrow_ref: (H_out, band_h)    banded row weights
        # wcol_ref: (n_t2, band_w, t2) banded column weights, per output tile
        # o_ref:    (bp, H_out, W_out)
        # tmp_ref:  (H_out, W_in)      scratch (mat_dtype), reused per plane so
        #                              only one plane's intermediate is live.
        for i in range(bp):                       # bp is small; static unroll
            # Pass 1 — row interpolation: contract H_in over its band only.
            for t in range(n_t1):
                o0 = t * t1
                ow = min(t1, h_out - o0)
                s = starts_h[t]                   # 8-aligned compile-time const
                xb = x_ref[i, s:s + band_h, :].astype(mat_dtype)
                blk = jnp.dot(wrow_ref[o0:o0 + ow, :], xb,
                              preferred_element_type=jnp.float32)
                tmp_ref[o0:o0 + ow, :] = blk.astype(tmp_ref.dtype)
            # Pass 2 — column interpolation: contract W_in over its band only.
            for t in range(n_t2):
                o0 = t * t2
                ow = min(t2, w_out - o0)
                s = starts_w[t]                   # 128-aligned compile-time const
                res = jnp.dot(tmp_ref[:, s:s + band_w], wcol_ref[t],
                              preferred_element_type=jnp.float32)[:, :ow]
                if round_output:
                    res = jnp.round(res)
                o_ref[i, :, o0:o0 + ow] = res.astype(o_ref.dtype)

    return kernel


def _plan_block_planes(n_planes, h_in, w_in, h_out, w_out, in_itemsize,
                       out_itemsize, mat_itemsize, band_h, band_w,
                       n_t1, n_t2, t1, t2, budget_bytes):
    """Largest plane batch whose per-step working set fits the VMEM budget."""
    # Constants: index map is constant so they are fetched once, but two
    # pipeline buffers exist -> count 2x.
    const_bytes = 2 * (h_out * band_h + n_t2 * band_w * t2) * mat_itemsize
    tmp_bytes = h_out * w_in * mat_itemsize
    # Largest in-kernel value temporaries (band cast copies + f32 results).
    live_bytes = (band_h * w_in * mat_itemsize + t1 * w_in * 4
                  + h_out * band_w * mat_itemsize + h_out * t2 * 4)
    fixed = const_bytes + tmp_bytes + live_bytes + (2 << 20)
    # Input block at the input dtype, output block at the OUTPUT dtype
    # (stays x.dtype even in bf16 MXU mode); both double-buffered.
    per_plane = 2 * h_in * w_in * in_itemsize + 2 * h_out * w_out * out_itemsize
    bp = (budget_bytes - fixed) // max(per_plane, 1)
    # Cap the static unroll (plane loop x tile loops) to keep compile sane;
    # scales with plane size instead of a flat plane cap.
    unroll_cap = max(8, _MAX_UNROLLED_MATMULS // max(1, n_t1 + n_t2))
    return int(max(1, min(bp, unroll_cap, n_planes)))


@functools.partial(
    jax.jit,
    static_argnames=("crop_size", "out_size", "block_planes", "mxu_dtype"))
def _center_crop_resize_impl(x, crop_size, out_size, block_planes, mxu_dtype):
    n, c, h_in, w_in = x.shape
    if crop_size > min(h_in, w_in):
        raise ValueError("crop_size must not exceed the input spatial size")
    mat_dtype = np.dtype(mxu_dtype)
    out_dtype = x.dtype
    h_out = w_out = out_size
    n_planes = n * c

    # Output-tile sizes (lane-dense 128 where possible).
    t1 = min(128, h_out)
    t2 = min(128, w_out)

    # Banded interpolation weights (crop offset folded into band starts).
    wrow_np, starts_h, band_h, n_t1 = _banded_axis(h_out, crop_size, h_in, t1, _SUBLANE)
    wcol_np2, starts_w, band_w, n_t2 = _banded_axis(w_out, crop_size, w_in, t2, _LANE)
    wcol_np = _col_weight_blocks(wcol_np2, w_out, t2, n_t2)
    wrow = jnp.asarray(wrow_np, dtype=mat_dtype)        # (H_out, band_h)
    wcol = jnp.asarray(wcol_np, dtype=mat_dtype)        # (n_t2, band_w, t2)

    # Per-generation VMEM sizing: 3/4 of capacity as the compiler limit
    # (96 MiB on v5e/v6e, 48 MiB on v7x), minus headroom for the planner.
    vmem_cap = _vmem_capacity_bytes()
    vmem_limit = (vmem_cap * 3) // 4
    budget = vmem_limit - (6 << 20)

    bp = block_planes
    if bp is None:
        bp = _plan_block_planes(
            n_planes, h_in, w_in, h_out, w_out,
            x.dtype.itemsize, np.dtype(out_dtype).itemsize, mat_dtype.itemsize,
            band_h, band_w, n_t1, n_t2, t1, t2, budget)
    bp = int(max(1, min(bp, n_planes)))
    if n_planes >= 2:
        bp = min(bp, -(-n_planes // 2))     # keep >=2 grid steps (v7x 2 TCs)
    # Snap to a divisor of n_planes: avoids an XLA pad that would copy the
    # whole input through HBM just to round up the grid.
    bp = max(d for d in range(1, bp + 1) if n_planes % d == 0)

    x_flat = x.reshape(n_planes, h_in, w_in)
    kernel = _make_kernel(bp, h_out, w_out, t1, t2, starts_h, band_h,
                          starts_w, band_w, mat_dtype,
                          jnp.issubdtype(out_dtype, jnp.integer))

    flops_per_plane = 2 * h_out * band_h * w_in + 2 * h_out * band_w * n_t2 * t2
    cost = pl.CostEstimate(
        flops=flops_per_plane * n_planes,
        transcendentals=0,
        bytes_accessed=(x_flat.size * x_flat.dtype.itemsize
                        + n_planes * h_out * w_out * np.dtype(out_dtype).itemsize
                        + wrow.size * wrow.dtype.itemsize
                        + wcol.size * wcol.dtype.itemsize))

    out_flat = pl.pallas_call(
        kernel,
        out_shape=jax.ShapeDtypeStruct((n_planes, h_out, w_out), out_dtype),
        grid_spec=pltpu.PrefetchScalarGridSpec(
            num_scalar_prefetch=0,
            grid=(n_planes // bp,),
            in_specs=[
                pl.BlockSpec((bp, h_in, w_in), lambda i: (i, 0, 0)),
                pl.BlockSpec((h_out, band_h), lambda i: (0, 0)),
                pl.BlockSpec((n_t2, band_w, t2), lambda i: (0, 0, 0)),
            ],
            out_specs=pl.BlockSpec((bp, h_out, w_out), lambda i: (i, 0, 0)),
            scratch_shapes=[pltpu.VMEM((h_out, w_in), mat_dtype)],
        ),
        compiler_params=pltpu.CompilerParams(
            dimension_semantics=("parallel",),
            vmem_limit_bytes=int(vmem_limit)),
        cost_estimate=cost,
    )(x_flat, wrow, wcol)

    return out_flat.reshape(n, c, out_size, out_size)


def center_crop_resize(x, crop_size=950, out_size=1024, block_planes=None,
                       mxu_dtype=jnp.bfloat16):
    """x: (N, C, H, W). Center-crop to crop_size, bilinear-resize to out_size.

    Matches torchvision CenterCrop + Resize for out_size >= crop_size (the
    module's 950 -> 1024 use case).  mxu_dtype defaults to bfloat16 (f32
    accumulation) for MXU throughput on v5e/v6e/v7x; pass jnp.float32 for
    bit-exact results (~1e-2 abs error otherwise).  For integer dtypes the
    result is rounded (half-to-even) before the final cast, so occasional
    LSB differences vs. PyTorch's float->uint8 path are possible.
    block_planes (optional) is an upper bound on planes per grid step.
    """
    return _center_crop_resize_impl(x, int(crop_size), int(out_size),
                                    block_planes, mxu_dtype)


if __name__ == "__main__":
    # Small shapes consistent with the module (scaled down from 950/1024):
    # crop 12 out of a 16x16 image, resize back to 16x16.
    N, C, H, W = 2, 4, 16, 16
    CROP, OUT = 12, 16

    key = jax.random.PRNGKey(0)
    x = jax.random.normal(key, (N, C, H, W), dtype=jnp.float32)

    # Pure-JAX reference: explicit crop + dense separable bilinear resize.
    top = int(round((H - CROP) / 2.0))
    left = int(round((W - CROP) / 2.0))
    lo, hi, w_lo, w_hi = _axis_taps(OUT, CROP, CROP)   # crop-local taps
    a_np = np.zeros((OUT, CROP))
    a_np[np.arange(OUT), lo] += w_lo
    a_np[np.arange(OUT), hi] += w_hi
    a_ref = jnp.asarray(a_np, jnp.float32)
    cropped = x[:, :, top:top + CROP, left:left + CROP]
    ref = jnp.einsum("oh,nchw,pw->ncop", a_ref, cropped, a_ref)

    # Default path: bf16 MXU inputs, f32 accumulation.
    y = center_crop_resize(x, crop_size=CROP, out_size=OUT)
    jax.block_until_ready(y)
    assert y.shape == (N, C, OUT, OUT), y.shape
    err_bf16 = float(jnp.max(jnp.abs(y - ref)))
    assert err_bf16 < 1e-1, err_bf16

    # Exact f32 path.
    y32 = center_crop_resize(x, crop_size=CROP, out_size=OUT,
                             mxu_dtype=jnp.float32)
    jax.block_until_ready(y32)
    err_f32 = float(jnp.max(jnp.abs(y32 - ref)))
    assert err_f32 < 1e-5, err_f32

    print("KERNEL_OK")
</pallas_src>

<mosaic_0001>
module attributes {stable_mosaic.version = 11 : i64} {
  func.func @kernel(%arg0: i32, %arg1: memref<4x16x16xf32, #tpu.memory_space<vmem>>, %arg2: memref<16x16xbf16, #tpu.memory_space<vmem>>, %arg3: memref<1x16x16xbf16, #tpu.memory_space<vmem>>, %arg4: memref<4x16x16xf32, #tpu.memory_space<vmem>>, %arg5: memref<16x16xbf16, #tpu.memory_space<vmem>>) attributes {dimension_semantics = [#tpu.dimension_semantics<parallel>], iteration_bounds = array<i64: 2>, scalar_prefetch = 0 : i64, scratch_operands = 1 : i64, tpu.core_type = #tpu.core_type<tc>, window_params = [{transform_indices = @transform_0, window_bounds = array<i64: 4, 16, 16>}, {pipeline_mode = #tpu.pipeline_mode<synchronous>, transform_indices = @transform_1, window_bounds = array<i64: 16, 16>}, {pipeline_mode = #tpu.pipeline_mode<synchronous>, transform_indices = @transform_2, window_bounds = array<i64: 1, 16, 16>}, {transform_indices = @transform_3, window_bounds = array<i64: 4, 16, 16>}]} {
    %c0 = arith.constant 0 : index
    %c0_0 = arith.constant 0 : index
    %c0_1 = arith.constant 0 : index
    %0 = vector.load %arg1[%c0, %c0_0, %c0_1] : memref<4x16x16xf32, #tpu.memory_space<vmem>>, vector<1x16x16xf32>
    %1 = vector.shape_cast %0 : vector<1x16x16xf32> to vector<16x16xf32>
    %2 = arith.truncf %1 : vector<16x16xf32> to vector<16x16xbf16>
    %c0_2 = arith.constant 0 : index
    %c0_3 = arith.constant 0 : index
    %3 = vector.load %arg2[%c0_2, %c0_3] : memref<16x16xbf16, #tpu.memory_space<vmem>>, vector<16x16xbf16>
    %cst = arith.constant dense<0.000000e+00> : vector<16x16xf32>
    %4 = tpu.matmul %3, %2, %cst {dimension_numbers = #tpu.dot_dimension_numbers<[1], [0], [0], [1], [0, 0, 1, 1], [], []>} : vector<16x16xbf16>, vector<16x16xbf16>, vector<16x16xf32> -> vector<16x16xf32>
    %5 = arith.truncf %4 : vector<16x16xf32> to vector<16x16xbf16>
    %c0_4 = arith.constant 0 : index
    %c0_5 = arith.constant 0 : index
    %6 = vector.load %arg5[%c0_4, %c0_5] : memref<16x16xbf16, #tpu.memory_space<vmem>>, vector<16x16xbf16>
    tpu.vector_store %arg5[%c0_4, %c0_5], %5 {strides = array<i32>} : memref<16x16xbf16, #tpu.memory_space<vmem>>, vector<16x16xbf16>,
    %c0_6 = arith.constant 0 : index
    %c0_7 = arith.constant 0 : index
    %7 = vector.load %arg5[%c0_6, %c0_7] : memref<16x16xbf16, #tpu.memory_space<vmem>>, vector<16x16xbf16>
    %c0_8 = arith.constant 0 : index
    %c0_9 = arith.constant 0 : index
    %c0_10 = arith.constant 0 : index
    %8 = vector.load %arg3[%c0_8, %c0_9, %c0_10] : memref<1x16x16xbf16, #tpu.memory_space<vmem>>, vector<1x16x16xbf16>
    %9 = vector.shape_cast %8 : vector<1x16x16xbf16> to vector<16x16xbf16>
    %cst_11 = arith.constant dense<0.000000e+00> : vector<16x16xf32>
    %10 = tpu.matmul %7, %9, %cst_11 {dimension_numbers = #tpu.dot_dimension_numbers<[1], [0], [0], [1], [0, 0, 1, 1], [], []>} : vector<16x16xbf16>, vector<16x16xbf16>, vector<16x16xf32> -> vector<16x16xf32>
    %c0_12 = arith.constant 0 : index
    %c0_13 = arith.constant 0 : index
    %c0_14 = arith.constant 0 : index
    %11 = vector.load %arg4[%c0_12, %c0_13, %c0_14] : memref<4x16x16xf32, #tpu.memory_space<vmem>>, vector<1x16x16xf32>
    %12 = vector.shape_cast %11 : vector<1x16x16xf32> to vector<16x16xf32>
    %13 = vector.shape_cast %10 : vector<16x16xf32> to vector<1x16x16xf32>
    tpu.vector_store %arg4[%c0_12, %c0_13, %c0_14], %13 {strides = array<i32>} : memref<4x16x16xf32, #tpu.memory_space<vmem>>, vector<1x16x16xf32>,
    %c1 = arith.constant 1 : index
    %c0_15 = arith.constant 0 : index
    %c0_16 = arith.constant 0 : index
    %14 = vector.load %arg1[%c1, %c0_15, %c0_16] : memref<4x16x16xf32, #tpu.memory_space<vmem>>, vector<1x16x16xf32>
    %15 = vector.shape_cast %14 : vector<1x16x16xf32> to vector<16x16xf32>
    %16 = arith.truncf %15 : vector<16x16xf32> to vector<16x16xbf16>
    %c0_17 = arith.constant 0 : index
    %c0_18 = arith.constant 0 : index
    %17 = vector.load %arg2[%c0_17, %c0_18] : memref<16x16xbf16, #tpu.memory_space<vmem>>, vector<16x16xbf16>
    %cst_19 = arith.constant dense<0.000000e+00> : vector<16x16xf32>
    %18 = tpu.matmul %17, %16, %cst_19 {dimension_numbers = #tpu.dot_dimension_numbers<[1], [0], [0], [1], [0, 0, 1, 1], [], []>} : vector<16x16xbf16>, vector<16x16xbf16>, vector<16x16xf32> -> vector<16x16xf32>
    %19 = arith.truncf %18 : vector<16x16xf32> to vector<16x16xbf16>
    %c0_20 = arith.constant 0 : index
    %c0_21 = arith.constant 0 : index
    %20 = vector.load %arg5[%c0_20, %c0_21] : memref<16x16xbf16, #tpu.memory_space<vmem>>, vector<16x16xbf16>
    tpu.vector_store %arg5[%c0_20, %c0_21], %19 {strides = array<i32>} : memref<16x16xbf16, #tpu.memory_space<vmem>>, vector<16x16xbf16>,
    %c0_22 = arith.constant 0 : index
    %c0_23 = arith.constant 0 : index
    %21 = vector.load %arg5[%c0_22, %c0_23] : memref<16x16xbf16, #tpu.memory_space<vmem>>, vector<16x16xbf16>
    %c0_24 = arith.constant 0 : index
    %c0_25 = arith.constant 0 : index
    %c0_26 = arith.constant 0 : index
    %22 = vector.load %arg3[%c0_24, %c0_25, %c0_26] : memref<1x16x16xbf16, #tpu.memory_space<vmem>>, vector<1x16x16xbf16>
    %23 = vector.shape_cast %22 : vector<1x16x16xbf16> to vector<16x16xbf16>
    %cst_27 = arith.constant dense<0.000000e+00> : vector<16x16xf32>
    %24 = tpu.matmul %21, %23, %cst_27 {dimension_numbers = #tpu.dot_dimension_numbers<[1], [0], [0], [1], [0, 0, 1, 1], [], []>} : vector<16x16xbf16>, vector<16x16xbf16>, vector<16x16xf32> -> vector<16x16xf32>
    %c1_28 = arith.constant 1 : index
    %c0_29 = arith.constant 0 : index
    %c0_30 = arith.constant 0 : index
    %25 = vector.load %arg4[%c1_28, %c0_29, %c0_30] : memref<4x16x16xf32, #tpu.memory_space<vmem>>, vector<1x16x16xf32>
    %26 = vector.shape_cast %25 : vector<1x16x16xf32> to vector<16x16xf32>
    %27 = vector.shape_cast %24 : vector<16x16xf32> to vector<1x16x16xf32>
    tpu.vector_store %arg4[%c1_28, %c0_29, %c0_30], %27 {strides = array<i32>} : memref<4x16x16xf32, #tpu.memory_space<vmem>>, vector<1x16x16xf32>,
    %c2 = arith.constant 2 : index
    %c0_31 = arith.constant 0 : index
    %c0_32 = arith.constant 0 : index
    %28 = vector.load %arg1[%c2, %c0_31, %c0_32] : memref<4x16x16xf32, #tpu.memory_space<vmem>>, vector<1x16x16xf32>
    %29 = vector.shape_cast %28 : vector<1x16x16xf32> to vector<16x16xf32>
    %30 = arith.truncf %29 : vector<16x16xf32> to vector<16x16xbf16>
    %c0_33 = arith.constant 0 : index
    %c0_34 = arith.constant 0 : index
    %31 = vector.load %arg2[%c0_33, %c0_34] : memref<16x16xbf16, #tpu.memory_space<vmem>>, vector<16x16xbf16>
    %cst_35 = arith.constant dense<0.000000e+00> : vector<16x16xf32>
    %32 = tpu.matmul %31, %30, %cst_35 {dimension_numbers = #tpu.dot_dimension_numbers<[1], [0], [0], [1], [0, 0, 1, 1], [], []>} : vector<16x16xbf16>, vector<16x16xbf16>, vector<16x16xf32> -> vector<16x16xf32>
    %33 = arith.truncf %32 : vector<16x16xf32> to vector<16x16xbf16>
    %c0_36 = arith.constant 0 : index
    %c0_37 = arith.constant 0 : index
    %34 = vector.load %arg5[%c0_36, %c0_37] : memref<16x16xbf16, #tpu.memory_space<vmem>>, vector<16x16xbf16>
    tpu.vector_store %arg5[%c0_36, %c0_37], %33 {strides = array<i32>} : memref<16x16xbf16, #tpu.memory_space<vmem>>, vector<16x16xbf16>,
    %c0_38 = arith.constant 0 : index
    %c0_39 = arith.constant 0 : index
    %35 = vector.load %arg5[%c0_38, %c0_39] : memref<16x16xbf16, #tpu.memory_space<vmem>>, vector<16x16xbf16>
    %c0_40 = arith.constant 0 : index
    %c0_41 = arith.constant 0 : index
    %c0_42 = arith.constant 0 : index
    %36 = vector.load %arg3[%c0_40, %c0_41, %c0_42] : memref<1x16x16xbf16, #tpu.memory_space<vmem>>, vector<1x16x16xbf16>
    %37 = vector.shape_cast %36 : vector<1x16x16xbf16> to vector<16x16xbf16>
    %cst_43 = arith.constant dense<0.000000e+00> : vector<16x16xf32>
    %38 = tpu.matmul %35, %37, %cst_43 {dimension_numbers = #tpu.dot_dimension_numbers<[1], [0], [0], [1], [0, 0, 1, 1], [], []>} : vector<16x16xbf16>, vector<16x16xbf16>, vector<16x16xf32> -> vector<16x16xf32>
    %c2_44 = arith.constant 2 : index
    %c0_45 = arith.constant 0 : index
    %c0_46 = arith.constant 0 : index
    %39 = vector.load %arg4[%c2_44, %c0_45, %c0_46] : memref<4x16x16xf32, #tpu.memory_space<vmem>>, vector<1x16x16xf32>
    %40 = vector.shape_cast %39 : vector<1x16x16xf32> to vector<16x16xf32>
    %41 = vector.shape_cast %38 : vector<16x16xf32> to vector<1x16x16xf32>
    tpu.vector_store %arg4[%c2_44, %c0_45, %c0_46], %41 {strides = array<i32>} : memref<4x16x16xf32, #tpu.memory_space<vmem>>, vector<1x16x16xf32>,
    %c3 = arith.constant 3 : index
    %c0_47 = arith.constant 0 : index
    %c0_48 = arith.constant 0 : index
    %42 = vector.load %arg1[%c3, %c0_47, %c0_48] : memref<4x16x16xf32, #tpu.memory_space<vmem>>, vector<1x16x16xf32>
    %43 = vector.shape_cast %42 : vector<1x16x16xf32> to vector<16x16xf32>
    %44 = arith.truncf %43 : vector<16x16xf32> to vector<16x16xbf16>
    %c0_49 = arith.constant 0 : index
    %c0_50 = arith.constant 0 : index
    %45 = vector.load %arg2[%c0_49, %c0_50] : memref<16x16xbf16, #tpu.memory_space<vmem>>, vector<16x16xbf16>
    %cst_51 = arith.constant dense<0.000000e+00> : vector<16x16xf32>
    %46 = tpu.matmul %45, %44, %cst_51 {dimension_numbers = #tpu.dot_dimension_numbers<[1], [0], [0], [1], [0, 0, 1, 1], [], []>} : vector<16x16xbf16>, vector<16x16xbf16>, vector<16x16xf32> -> vector<16x16xf32>
    %47 = arith.truncf %46 : vector<16x16xf32> to vector<16x16xbf16>
    %c0_52 = arith.constant 0 : index
    %c0_53 = arith.constant 0 : index
    %48 = vector.load %arg5[%c0_52, %c0_53] : memref<16x16xbf16, #tpu.memory_space<vmem>>, vector<16x16xbf16>
    tpu.vector_store %arg5[%c0_52, %c0_53], %47 {strides = array<i32>} : memref<16x16xbf16, #tpu.memory_space<vmem>>, vector<16x16xbf16>,
    %c0_54 = arith.constant 0 : index
    %c0_55 = arith.constant 0 : index
    %49 = vector.load %arg5[%c0_54, %c0_55] : memref<16x16xbf16, #tpu.memory_space<vmem>>, vector<16x16xbf16>
    %c0_56 = arith.constant 0 : index
    %c0_57 = arith.constant 0 : index
    %c0_58 = arith.constant 0 : index
    %50 = vector.load %arg3[%c0_56, %c0_57, %c0_58] : memref<1x16x16xbf16, #tpu.memory_space<vmem>>, vector<1x16x16xbf16>
    %51 = vector.shape_cast %50 : vector<1x16x16xbf16> to vector<16x16xbf16>
    %cst_59 = arith.constant dense<0.000000e+00> : vector<16x16xf32>
    %52 = tpu.matmul %49, %51, %cst_59 {dimension_numbers = #tpu.dot_dimension_numbers<[1], [0], [0], [1], [0, 0, 1, 1], [], []>} : vector<16x16xbf16>, vector<16x16xbf16>, vector<16x16xf32> -> vector<16x16xf32>
    %c3_60 = arith.constant 3 : index
    %c0_61 = arith.constant 0 : index
    %c0_62 = arith.constant 0 : index
    %53 = vector.load %arg4[%c3_60, %c0_61, %c0_62] : memref<4x16x16xf32, #tpu.memory_space<vmem>>, vector<1x16x16xf32>
    %54 = vector.shape_cast %53 : vector<1x16x16xf32> to vector<16x16xf32>
    %55 = vector.shape_cast %52 : vector<16x16xf32> to vector<1x16x16xf32>
    tpu.vector_store %arg4[%c3_60, %c0_61, %c0_62], %55 {strides = array<i32>} : memref<4x16x16xf32, #tpu.memory_space<vmem>>, vector<1x16x16xf32>,
    return
  }
  func.func @transform_0(%arg0: i32) -> (i32, i32, i32) {
    %c0_i32 = arith.constant 0 : i32
    %c0_i32_0 = arith.constant 0 : i32
    %c0_i32_1 = arith.constant 0 : i32
    return %arg0, %c0_i32, %c0_i32_0 : i32, i32, i32
  }
  func.func @transform_1(%arg0: i32) -> (i32, i32) {
    %c0_i32 = arith.constant 0 : i32
    %c0_i32_0 = arith.constant 0 : i32
    %c0_i32_1 = arith.constant 0 : i32
    return %c0_i32, %c0_i32_0 : i32, i32
  }
  func.func @transform_2(%arg0: i32) -> (i32, i32, i32) {
    %c0_i32 = arith.constant 0 : i32
    %c0_i32_0 = arith.constant 0 : i32
    %c0_i32_1 = arith.constant 0 : i32
    %c0_i32_2 = arith.constant 0 : i32
    return %c0_i32, %c0_i32_0, %c0_i32_1 : i32, i32, i32
  }
  func.func @transform_3(%arg0: i32) -> (i32, i32, i32) {
    %c0_i32 = arith.constant 0 : i32
    %c0_i32_0 = arith.constant 0 : i32
    %c0_i32_1 = arith.constant 0 : i32
    return %arg0, %c0_i32, %c0_i32_0 : i32, i32, i32
  }
}

</mosaic_0001>

<bundles_post_ra>
// kernel: _center_crop_resize_impl.1
= control target key start
LH: loop header
LB: loop body
LE: loop exit
PB: predicated region body
PF: predicated region fallthrough
CT: control target
= control target key end

     0   :  { %8 = vsyncpa [#allocation4], 0  ;;  %s1492_s0 = inlined_call_operand.hbm [shape: f32[8,16,16], index: 0, kind: input, shape index: {}]   ;;  %s1493_s1 = inlined_call_operand.hbm [shape: bf16[16,16], index: 1, kind: input, shape index: {}]   ;;  %s1494_s2 = inlined_call_operand.hbm [shape: bf16[1,16,16], index: 2, kind: input, shape index: {}]   ;;  %s1495_s3 = inlined_call_operand.hbm [shape: f32[8,16,16], index: 3, kind: output, shape index: {}]  }
   0x1   :  { %10 = vsyncpa [#allocation4 + $0x1], 0 }
   0x2   :  { %11 = vsyncpa [#allocation7], 0 }
   0x3   :  { %12 = vsyncpa [#allocation5], 0 }
   0x4   :  { %14 = vsyncpa [#allocation5 + $0x1], 0  ;;  %s1242_s12 = smov 0   ;;  %s1244_s13 = smov 0  }
   0x5   :  { %s1246_s14 = smov 0   ;;  %s1248_s15 = smov 0  }
   0x6 LB: > { %s1263_s16 = sadd.s32 4294967295, %s1208_s15   ;;  %s837_s17 = sadd.s32 4294967294, %s1208_s15   ;;  %s1208_s15 = sphi %s1248_s15, %s1517_s15   ;;  %s1204_s14 = sphi %s1246_s14, %s1516_s14   ;;  %s1200_s13 = sphi %s1244_s13, %s1515_s13   ;;  %s1196_s12 = sphi %s1242_s12, %s1514_s12  }
   0x7   : > { %p40_p0 = scmp.ne.s32.totalorder %s1200_s13, %s1196_s12  ;;  %p1496_p1 = scmp.eq.s32.totalorder %s1263_s16, 0 }
   0x8   : > { %p112_p3 = scmp.eq.s32.totalorder %s837_s17, 1  ;;  %p838_p5 = scmp.ge.s32.totalorder %s1208_s15, 1 }
   0x9   : > { %p1272_p4 = por %p1496_p1, %p40_p0  ;;  %p119_p7 = scmp.lt.s32.totalorder %s1208_s15, 3 }
   0xa   : > { %p1277_p6 = por %p112_p3, %p40_p0  ;;  %s1210_s21 = smov [#allocation6]  }
   0xb   : > { %s1500_s18 = scalar_select %p1272_p4, 1, 0 }
   0xc   : > { %s1501_s19 = scalar_select %p1277_p6, 1, 0 }
   0xd   : > { %p1282_p8 = pnand %p838_p5, %p119_p7  ;;  %s131_s22 = sshll.u32 %s1210_s21, 4  ;;  %s132_s22 = int_to_ptr.vmem [resolvable:$true] %s131_s22 }
   0xe   : > { %s1211_s24 = smov [#allocation8]   ;;  %s1071_s26 = scalar_lea.vmem %s132_s22, 128 }
   0xf   : > { %s1502_s20 = scalar_select %p1282_p8, 1, 0 }
  0x10   : > { %p985_p9 = pneg %p1282_p8  ;;  %s144_s25 = sshll.u32 %s1211_s24, 4  ;;  %s145_s25 = int_to_ptr.vmem [resolvable:$true] %s144_s25 }
  0x11   : > { %p1072_p13 = scmp.ne.s32.totalorder %s132_s22, %s1071_s26  ;;  %p1079_p5 = scmp.lt.s32.totalorder %s132_s22, %s132_s22 }
  0x12   : > { %p1291_p11 = pnand %p985_p9, %p1496_p1  ;;  %p1080_p7 = scmp.lt.s32.totalorder %s1071_s26, %s1071_s26 }
  0x14   : > { %p1062_p12 = pneg %p1291_p11  ;;  %p1081_p10 = por %p1080_p7, %p1079_p5 }
  0x16   : > { %p1074_p0 = pnand %p1072_p13, %p1062_p12 }
  0x18   : > { %p1075_p3 = pneg %p1074_p0 }
  0x1a   : > { %p1082_p9 = pnand %p1081_p10, %p1075_p3 }
  0x1c   : > { %1085 = shalt.err (!%p1082_p9)
}
  0x1d   : > { %s1212_s27 = smov 64   ;;  %s1213_s28 = smov 4  }
  0x1e   : > { %988 = dma.hbm_to_vmem [thread:$0]  (!%p1291_p11), %s1493_s1, 128, %s132_s22, [#allocation7], %s1212_s27, %s1212_s27, %s1213_s28  }
  0x1f   : > { %s1097_s4 = scalar_lea.vmem %s145_s25, 128  ;;  %p1105_p2 = scmp.lt.s32.totalorder %s145_s25, %s145_s25 }
  0x20   : > { %p1098_p1 = scmp.ne.s32.totalorder %s145_s25, %s1097_s4  ;;  %p1106_p6 = scmp.lt.s32.totalorder %s1097_s4, %s1097_s4 }
  0x22   : > { %p1100_p13 = pnand %p1098_p1, %p1062_p12  ;;  %p1107_p5 = por %p1106_p6, %p1105_p2 }
  0x24   : > { %p1101_p0 = pneg %p1100_p13 }
  0x26   : > { %p1108_p10 = pnand %p1107_p5, %p1101_p0 }
  0x28   : > { %1111 = shalt.err (!%p1108_p10)
}
  0x29   : > { %991 = dma.hbm_to_vmem [thread:$0]  (!%p1291_p11), %s1494_s2, 128, %s145_s25, [#allocation7], %s1212_s27, %s1212_s27, %s1213_s28  }
  0x2a   : > { %s1314_s7 = sadd.s32 1, %s1208_s15   ;;  %s27_s8 = sadd.s32 1, %s1204_s14 }
  0x2b   : > { %s24_s9 = ssub.s32 %s1208_s15, %s1314_s7  ;;  %p34_p1 = scmp.ne.s32.totalorder %s1204_s14, %s1200_s13 }
  0x2c   : > { %p25_p2 = scmp.eq.s32.totalorder %s24_s9, 0  ;;  %p35_p6 = scmp.eq.s32.totalorder %s1208_s15, 0 }
  0x2d   : > { %p1504_p12 = scmp.eq.s32.totalorder %s1263_s16, 1  ;;  %p1002_p7 = scmp.lt.s32.totalorder %s1208_s15, 2 }
  0x2e   : > { %s1330_s11 = scalar_select %p25_p2, %s1204_s14, %s27_s8  }
  0x2f   : > { %p1324_p3 = por %p1504_p12, %p34_p1  ;;  %p36_p9 = por %p35_p6, %p34_p1 }
  0x30   : > { %s158_s17 = sand.u32 1, %s1204_s14   ;;  %s898_s22 = sshll.u32 %s1208_s15, 10 }
  0x31   : > { %s1505_s10 = scalar_select %p1324_p3, 1, 0 }
  0x32   : > { %s842_s21 = sshll.u32 %s158_s17, 6  ;;  %s1337_s25 = scalar_lea.hbm %s1492_s0, %s898_s22 }
  0x33   : > { %s162_s26 = scalar_lea.vmem [#allocation3], %s842_s21  ;;  %p1341_p11 = pnand %p1002_p7, %p36_p9 }
  0x34   : > { %s170_s27 = sshll.u32 %s162_s26, 4  ;;  %s1345_s29 = scalar_lea.sflag [#allocation4], %s158_s17  ;;  %s1339_s27 = int_to_ptr.vmem [resolvable:$true] %s170_s27 }
  0x35   : > { %s1112_s30 = scalar_lea.hbm %s1337_s25, 1024  ;;  %p1114_p0 = pneg %p1341_p11 }
  0x36   : > { %p1113_p13 = scmp.ne.s32.totalorder %s1337_s25, %s1112_s30  ;;  %s1117_s6 = scalar_lea.hbm %s1492_s0, 2048 }
  0x37   : > { %p1118_p1 = scmp.lt.s32.totalorder %s1337_s25, %s1492_s0  ;;  %p1119_p2 = scmp.lt.s32.totalorder %s1117_s6, %s1112_s30 }
  0x38   : > { %p1115_p5 = pnand %p1114_p0, %p1113_p13 }
  0x39   : > { %p1120_p6 = por %p1119_p2, %p1118_p1 }
  0x3a   : > { %p1116_p10 = pneg %p1115_p5 }
  0x3c   : > { %p1121_p12 = pnand %p1120_p6, %p1116_p10 }
  0x3e   : > { %1124 = shalt.err (!%p1121_p12)
}
  0x3f   : > { %s1125_s17 = scalar_lea.vmem %s1339_s27, 1024  ;;  %s1214_s21 = smov [#allocation3]  }
  0x40   : > { %p1126_p7 = scmp.ne.s32.totalorder %s1339_s27, %s1125_s17  ;;  %s1130_s22 = sshll.u32 %s1214_s21, 4  ;;  %s1131_s22 = int_to_ptr.vmem [resolvable:$false] %s1130_s22 }
  0x41   : > { %s1132_s23 = scalar_lea.vmem %s1131_s22, 2048  ;;  %p1133_p5 = scmp.lt.s32.totalorder %s1339_s27, %s1131_s22 }
  0x42   : > { %p1128_p9 = pnand %p1126_p7, %p1114_p0  ;;  %p1134_p3 = scmp.lt.s32.totalorder %s1132_s23, %s1125_s17 }
  0x44   : > { %p1129_p13 = pneg %p1128_p9  ;;  %p1135_p4 = por %p1134_p3, %p1133_p5 }
  0x46   : > { %p1136_p8 = pnand %p1135_p4, %p1129_p13 }
  0x48   : > { %1139 = shalt.err (!%p1136_p8)
}
  0x49   : > { %s1215_s24 = smov 128   ;;  %s1216_s26 = smov 8  }
  0x4a   : > { %995 = dma.hbm_to_vmem [thread:$0]  (!%p1341_p11), %s1337_s25, 1024, %s1339_s27, %s1345_s29, %s1215_s24, %s1215_s24, %s1216_s26  }
  0x4b   : > { %p1507_p0 = scmp.ne.s32.totalorder %s1502_s20, 0 }
  0x4c   : > { %s1369_s30 = sand.u32 (!%p1507_p0), 1, %s1200_s13   ;;  %p1508_p4 = scmp.ne.s32.totalorder (!%p1507_p0), %s1500_s18, 0 }
  0x4d   : > { %182 = sbr.rel (%p1507_p0) target bundleno = 535 (0x217), region = 32  ;;  %s847_s4 = sshll.u32 (!%p1507_p0), %s1369_s30, 6 }
  0x4e   : > { %s185_s5 = scalar_lea.sflag (!%p1507_p0), [#allocation4], %s1369_s30  ;;  %s1375_s6 = scalar_lea.vmem (!%p1507_p0), [#allocation3], %s847_s4 }
  0x52   : > { %1183 = dma.done.wait (%p1508_p4), %s185_s5, 1024  }
  0x53   : > { %1185 = vsyncadd (%p1508_p4), %s185_s5, 4294966272  ;;  %p1509_p8 = scmp.eq.s32.totalorder %s1263_s16, 0 }
  0x55   : > { %1187 = dma.done.wait (%p1509_p8), [#allocation7], 256   ;;  %p1510_p3 = pmov %p1509_p8 }
  0x56   : > { %v1217_v0 = vmov 0.0   ;;  %vm1218_vm0 = vmmov 0   ;;  %v222_v1 = vld [vmem:[%s1375_s6] sm:$0xff]  ;;  %v223_v2 = vld [vmem:[%s1375_s6 + $0x8] sm:$0xff]  ;;  %v858_v5 = vld [vmem:[%s1375_s6 + $0x10] sm:$0xff]  ;;  %vm232_vm1 = vcmask 130048  }
  0x57   : > { %1189 = vsyncadd (%p1510_p3), [#allocation7], 4294967040  ;;  %925 = vmatprep.subr.bf16.mxu0 %v1217_v0  ;;  %927 = vmatprep.mubr.msk.bf16.mxu0 %vm1218_vm0, %v1217_v0  ;;  %v224_v3 = vpack.c.bf16 %v223_v2, %v222_v1  ;;  %v1048_v4 = vld [vmem:[#allocation6] sm:$0xff]   ;;  %v859_v6 = vld [vmem:[%s1375_s6 + $0x18] sm:$0xff]  ;;  %vm285_vm2 = vcmask 125952   ;;  %s218_s18 = scalar_lea.vmem [#allocation9], %s847_s4 }
  0x58   : > { %931 = vmatprep.subr.bf16.mxu1 %v1217_v0  ;;  %933 = vmatprep.mubr.msk.bf16.mxu1 %vm1218_vm0, %v1217_v0  ;;  %v352_v7 = vpack.c.bf16 %v859_v6, %v858_v5  ;;  %v869_v8 = vld [vmem:[%s1375_s6 + $0x20] sm:$0xff]  ;;  %v870_v9 = vld [vmem:[%s1375_s6 + $0x28] sm:$0xff]  ;;  %v880_v12 = vld [vmem:[%s1375_s6 + $0x30] sm:$0xff]  ;;  %s745_s20 = sshll.u32 %s218_s18, 4  ;;  %s908_s25 = sshll.u32 %s1263_s16, 10  ;;  %s1442_s20 = int_to_ptr.vmem [resolvable:$true] %s745_s20 }
  0x59   : > { %926 = vmatpush3.bf16.msra.mxu0 %v224_v3  ;;  %v1049_v10 = vld [vmem:[#allocation6] sm:$0xff]   ;;  %v479_v11 = vpack.c.bf16 %v870_v9, %v869_v8  ;;  %v881_v13 = vld [vmem:[%s1375_s6 + $0x38] sm:$0xff]  ;;  %v1052_v17 = vld [vmem:[#allocation8] sm:$0xff]   ;;  %s1448_s29 = scalar_lea.hbm %s1495_s3, %s908_s25  ;;  %s731_s8 = scalar_lea.sflag [#allocation5], %s1369_s30 }
  0x5a   : > { %937 = vmatprep.subr.bf16.mxu0 %v1217_v0  ;;  %v1050_v14 = vld [vmem:[#allocation6] sm:$0xff]   ;;  %v606_v15 = vpack.c.bf16 %v881_v13, %v880_v12  ;;  %932 = vmatpush3.bf16.msra.mxu1 %v1052_v17  ;;  %v1054_v29 = vld [vmem:[#allocation8] sm:$0xff]   ;;  %s1140_s16 = scalar_lea.vmem %s1442_s20, 1024  ;;  %p1511_p10 = scmp.ne.s32.totalorder %s1505_s10, 0 }
  0x5b   : > { %v1051_v16 = vld [vmem:[#allocation6] sm:$0xff]   ;;  %943 = vmatprep.subr.bf16.mxu1 %v1217_v0  ;;  %v1056_v37 = vld [vmem:[#allocation8] sm:$0xff]   ;;  %p1141_p11 = scmp.ne.s32.totalorder %s1442_s20, %s1140_s16  ;;  %s1219_s9 = smov [#allocation9]  }
  0x5c   : > { %928 = vmatmul.mubr.msk.bf16.vlgmr.msra.gmra.mxu0 %vm232_vm1, %v1048_v4  ;;  %v1058_v45 = vld [vmem:[#allocation8] sm:$0xff]   ;;  %s1144_s17 = sshll.u32 %s1219_s9, 4  ;;  %s1145_s17 = int_to_ptr.vmem [resolvable:$false] %s1144_s17 }
  0x5d   : > { %938 = vmatpush3.bf16.msra.mxu0 %v352_v7  ;;  %939 = vmatprep.mubr.msk.bf16.mxu0 %vm1218_vm0, %v1217_v0  ;;  %p1142_p1 = pnand %p1141_p11, %p1511_p10  ;;  %s1146_s21 = scalar_lea.vmem %s1145_s17, 2048 }
  0x5e   : > { %949 = vmatprep.subr.bf16.mxu0 %v1217_v0  ;;  %p1147_p6 = scmp.lt.s32.totalorder %s1442_s20, %s1145_s17  ;;  %p1148_p12 = scmp.lt.s32.totalorder %s1146_s21, %s1140_s16 }
  0x5f   : > { %p1143_p2 = pneg %p1142_p1 }
  0x60   : > { %p1149_p7 = por %p1148_p12, %p1147_p6 }
  0x62   : > { %p1150_p9 = pnand %p1149_p7, %p1143_p2 }
  0x64   : > { %940 = vmatmul.mubr.msk.bf16.vlgmr.msra.gmra.mxu0 %vm232_vm1, %v1049_v10 }
  0x65   : > { %950 = vmatpush3.bf16.msra.mxu0 %v479_v11  ;;  %951 = vmatprep.mubr.msk.bf16.mxu0 %vm1218_vm0, %v1217_v0 }
  0x66   : > { %961 = vmatprep.subr.bf16.mxu0 %v1217_v0 }
  0x6c   : > { %952 = vmatmul.mubr.msk.bf16.vlgmr.msra.gmra.mxu0 %vm232_vm1, %v1050_v14 }
  0x6d   : > { %962 = vmatpush3.bf16.msra.mxu0 %v606_v15  ;;  %963 = vmatprep.mubr.msk.bf16.mxu0 %vm1218_vm0, %v1217_v0 }
  0x74   : > { %964 = vmatmul.mubr.msk.bf16.vlgmr.msra.gmra.mxu0 %vm232_vm1, %v1051_v16 }
 0x11c   : > { %v270_v18 = vpop.f32.mrf.mxu0 }
 0x11d   : > { %v899_v19 = vpack.c.bf16 %v270_v18, %v270_v18 }
 0x11e   : > { %v929_v20 = vpop.f32.mrf.mxu0 }
 0x11f   : > { %286 = vst.msk [vmem:[#allocation2] sm:$0xf] %vm285_vm2, %v899_v19 }
 0x120   : > { %v273_v21 = vpop.f32.mrf.mxu0 }
 0x121   : > { %v900_v22 = vpack.c.bf16 %v273_v21, %v273_v21 }
 0x122   : > { %v930_v23 = vpop.f32.mrf.mxu0 }
 0x123   : > { %287 = vst.msk [vmem:[#allocation2 + $0x4] sm:$0xf] %vm285_vm2, %v900_v22 }
 0x124   : > { %v397_v24 = vpop.f32.mrf.mxu0 }
 0x125   : > { %v901_v27 = vpack.c.bf16 %v397_v24, %v397_v24 }
 0x126   : > { %v941_v25 = vpop.f32.mrf.mxu0 }
 0x128   : > { %v400_v26 = vpop.f32.mrf.mxu0 }
 0x129   : > { %v902_v28 = vpack.c.bf16 %v400_v26, %v400_v26 }
 0x12a   : > { %v942_v30 = vpop.f32.mrf.mxu0  ;;  %v1053_v31 = vld [vmem:[#allocation2] sm:$0xff]  }
 0x12b   : > { %412 = vst.msk [vmem:[#allocation2] sm:$0xf] %vm285_vm2, %v901_v27  ;;  %413 = vst.msk [vmem:[#allocation2 + $0x4] sm:$0xf] %vm285_vm2, %v902_v28  ;;  %934 = vmatmul.mubr.msk.bf16.vlgmr.msra.gmra.mxu1 %vm232_vm1, %v1053_v31 }
 0x12c   : > { %v524_v32 = vpop.f32.mrf.mxu0  ;;  %944 = vmatpush3.bf16.msra.mxu1 %v1054_v29  ;;  %945 = vmatprep.mubr.msk.bf16.mxu1 %vm1218_vm0, %v1217_v0 }
 0x12d   : > { %955 = vmatprep.subr.bf16.mxu1 %v1217_v0  ;;  %v903_v35 = vpack.c.bf16 %v524_v32, %v524_v32 }
 0x12e   : > { %v953_v33 = vpop.f32.mrf.mxu0 }
 0x130   : > { %v527_v34 = vpop.f32.mrf.mxu0 }
 0x131   : > { %v904_v36 = vpack.c.bf16 %v527_v34, %v527_v34 }
 0x132   : > { %v954_v38 = vpop.f32.mrf.mxu0  ;;  %v1055_v39 = vld [vmem:[#allocation2] sm:$0xff]  }
 0x133   : > { %539 = vst.msk [vmem:[#allocation2] sm:$0xf] %vm285_vm2, %v903_v35  ;;  %540 = vst.msk [vmem:[#allocation2 + $0x4] sm:$0xf] %vm285_vm2, %v904_v36  ;;  %946 = vmatmul.mubr.msk.bf16.vlgmr.msra.gmra.mxu1 %vm232_vm1, %v1055_v39 }
 0x134   : > { %v651_v40 = vpop.f32.mrf.mxu0  ;;  %956 = vmatpush3.bf16.msra.mxu1 %v1056_v37  ;;  %957 = vmatprep.mubr.msk.bf16.mxu1 %vm1218_vm0, %v1217_v0 }
 0x135   : > { %967 = vmatprep.subr.bf16.mxu1 %v1217_v0  ;;  %v905_v43 = vpack.c.bf16 %v651_v40, %v651_v40 }
 0x136   : > { %v965_v41 = vpop.f32.mrf.mxu0 }
 0x138   : > { %v654_v42 = vpop.f32.mrf.mxu0 }
 0x139   : > { %v906_v44 = vpack.c.bf16 %v654_v42, %v654_v42 }
 0x13a   : > { %v966_v46 = vpop.f32.mrf.mxu0  ;;  %v1057_v47 = vld [vmem:[#allocation2] sm:$0xff]  }
 0x13b   : > { %666 = vst.msk [vmem:[#allocation2] sm:$0xf] %vm285_vm2, %v905_v43  ;;  %667 = vst.msk [vmem:[#allocation2 + $0x4] sm:$0xf] %vm285_vm2, %v906_v44  ;;  %958 = vmatmul.mubr.msk.bf16.vlgmr.msra.gmra.mxu1 %vm232_vm1, %v1057_v47 }
 0x13c   : > { %968 = vmatpush3.bf16.msra.mxu1 %v1058_v45  ;;  %969 = vmatprep.mubr.msk.bf16.mxu1 %vm1218_vm0, %v1217_v0 }
 0x142   : > { %v1059_v48 = vld [vmem:[#allocation2] sm:$0xff]  }
 0x143   : > { %970 = vmatmul.mubr.msk.bf16.vlgmr.msra.gmra.mxu1 %vm232_vm1, %v1059_v48 }
 0x1eb   : > { %v340_v49 = vpop.f32.mrf.mxu1 }
 0x1ec   : > { %347 = vst.msk [vmem:[%s218_s18] sm:$0xff] %vm232_vm1, %v340_v49 }
 0x1ed   : > { %v935_v50 = vpop.f32.mrf.mxu1 }
 0x1ef   : > { %v343_v51 = vpop.f32.mrf.mxu1 }
 0x1f0   : > { %348 = vst.msk [vmem:[%s218_s18 + $0x8] sm:$0xff] %vm232_vm1, %v343_v51 }
 0x1f1   : > { %v936_v52 = vpop.f32.mrf.mxu1 }
 0x1f3   : > { %v466_v53 = vpop.f32.mrf.mxu1 }
 0x1f4   : > { %867 = vst.msk [vmem:[%s218_s18 + $0x10] sm:$0xff] %vm232_vm1, %v466_v53 }
 0x1f5   : > { %v947_v54 = vpop.f32.mrf.mxu1 }
 0x1f7   : > { %v469_v55 = vpop.f32.mrf.mxu1 }
 0x1f8   : > { %868 = vst.msk [vmem:[%s218_s18 + $0x18] sm:$0xff] %vm232_vm1, %v469_v55 }
 0x1f9   : > { %v948_v56 = vpop.f32.mrf.mxu1 }
 0x1fb   : > { %v593_v57 = vpop.f32.mrf.mxu1 }
 0x1fc   : > { %878 = vst.msk [vmem:[%s218_s18 + $0x20] sm:$0xff] %vm232_vm1, %v593_v57 }
 0x1fd   : > { %v959_v58 = vpop.f32.mrf.mxu1 }
 0x1ff   : > { %v596_v59 = vpop.f32.mrf.mxu1 }
 0x200   : > { %879 = vst.msk [vmem:[%s218_s18 + $0x28] sm:$0xff] %vm232_vm1, %v596_v59 }
 0x201   : > { %v960_v60 = vpop.f32.mrf.mxu1 }
 0x203   : > { %v720_v61 = vpop.f32.mrf.mxu1 }
 0x204   : > { %889 = vst.msk [vmem:[%s218_s18 + $0x30] sm:$0xff] %vm232_vm1, %v720_v61 }
 0x205   : > { %v971_v62 = vpop.f32.mrf.mxu1 }
 0x207   : > { %v723_v63 = vpop.f32.mrf.mxu1 }
 0x208   : > { %890 = vst.msk [vmem:[%s218_s18 + $0x38] sm:$0xff] %vm232_vm1, %v723_v63 }
 0x209   : > { %v972_v0 = vpop.f32.mrf.mxu1 }
 0x20a   : > { %1153 = shalt.err (!%p1150_p9)
}
 0x20b   : > { %s1154_s22 = scalar_lea.hbm %s1448_s29, 1024  ;;  %s1158_s26 = scalar_lea.hbm %s1495_s3, 2048 }
 0x20c   : > { %p1155_p13 = scmp.ne.s32.totalorder %s1448_s29, %s1154_s22  ;;  %p1159_p4 = scmp.lt.s32.totalorder %s1448_s29, %s1495_s3 }
 0x20d   : > { %p1160_p8 = scmp.lt.s32.totalorder %s1158_s26, %s1154_s22 }
 0x20e   : > { %p1156_p5 = pnand %p1155_p13, %p1511_p10 }
 0x20f   : > { %p1161_p3 = por %p1160_p8, %p1159_p4 }
 0x210   : > { %p1157_p0 = pneg %p1156_p5 }
 0x212   : > { %p1162_p11 = pnand %p1161_p3, %p1157_p0 }
 0x214   : > { %1165 = shalt.err (!%p1162_p11)
}
 0x215   : > { %s1220_s6 = smov 128   ;;  %s1221_s18 = smov 8  }
 0x216   : > { %983 = dma.vmem_to_hbm [thread:$0]  (%p1511_p10), %s1442_s20, 1024, %s1448_s29, %s731_s8, %s1220_s6, %s1220_s6, %s1221_s18  }
 0x217 PF: > { %s760_s25 = sand.u32 1, %s1196_s12   ;;  %p1512_p1 = scmp.ne.s32.totalorder %s1501_s19, 0 }
 0x218   : > { %p1513_p2 = scmp.ge.s32.totalorder %s1208_s15, 2  ;;  %s761_s27 = scalar_lea.sflag [#allocation5], %s760_s25 }
 0x21a   : > { %p997_p6 = pnand %p1513_p2, %p1512_p1 }
 0x21c   : > { %p998_p12 = pneg %p997_p6 }
 0x21e   : > { %1191 = dma.done.wait (%p998_p12), %s761_s27, 1024  }
 0x21f   : > { %1193 = vsyncadd (%p998_p12), %s761_s27, 4294966272  ;;  %p17_p7 = scmp.ge.s32.totalorder %s1314_s7, 4   ;;  %s1514_s12 = smov %s1200_s13 }
 0x220   : > { %s1515_s13 = smov %s1204_s14  ;;  %s1516_s14 = smov %s1330_s11 }
 0x221   : > { %s1517_s15 = smov %s1314_s7  ;;  %19 = sbr.rel (!%p17_p7) target bundleno = 6 (0x6), region = 91 }
 0x226   :  { %766 = vsyncpa [#allocation4], 1 }
 0x227   :  { %768 = vsyncpa [#allocation4 + $0x1], 1 }
 0x228   :  { %769 = vsyncpa [#allocation7], 1 }
 0x229   :  { %770 = vsyncpa [#allocation5], 1 }
 0x22a   :  { %772 = vsyncpa [#allocation5 + $0x1], 1 }

</bundles_post_ra>
